<compile_context>
chip_gen: v5e
topology: v5e:2x2
jax: 0.10.0
libtpu: 0.0.40
codegen_flags: <defaults>
</compile_context>

<pallas_src>
import functools
import math

import jax
import jax.numpy as jnp
from jax.experimental import pallas as pl
from jax.experimental.pallas import tpu as pltpu

BN_EPS = 1e-5
HIDDEN = 1024


def _round_up(n, m):
    return ((n + m - 1) // m) * m


# ----------------------------------------------------------------------------
# Kernel
# ----------------------------------------------------------------------------
def simplenet_head_kernel(
    x_ref,        # (TB, C, THW) native dtype  input activation tile
    w1m_ref,      # (C, HIDDEN)  bf16  BN1-folded Linear1 weights, max-pool half
    w1a_ref,      # (C, HIDDEN)  bf16  BN1-folded Linear1 weights, avg-pool half
    b1_ref,       # (1, HIDDEN)  f32   BN1-folded Linear1 bias
    w2_ref,       # (HIDDEN,NCP) bf16  BN2-folded Linear2 weights (class-padded)
    b2_ref,       # (1, NCP)     f32   BN2-folded Linear2 bias (-1e30 on padded cols)
    out_ref,      # (TB, NCP)    f32   log-softmax output (class-padded)
    mx_acc,       # (TB, C) f32 scratch: running max over HW
    sm_acc,       # (TB, C) f32 scratch: running sum over HW
    *,
    hw_total,
):
    hw_step = pl.program_id(1)

    @pl.when(hw_step == 0)
    def _init():
        mx_acc[...] = jnp.full_like(mx_acc, -jnp.inf)
        sm_acc[...] = jnp.zeros_like(sm_acc)

    # AdaptiveConcatPool2d pieces: running max / running sum over the HW axis.
    # Stream arrives in its native dtype; reduce/accumulate in f32.
    xf = x_ref[...].astype(jnp.float32)                     # (TB, C, THW)
    mx_acc[...] = jnp.maximum(mx_acc[...], jnp.max(xf, axis=-1))
    sm_acc[...] = sm_acc[...] + jnp.sum(xf, axis=-1)

    @pl.when(hw_step == pl.num_programs(1) - 1)
    def _finalize():
        mx = mx_acc[...]                                    # (TB, C) max-pool
        av = sm_acc[...] * (1.0 / hw_total)                 # (TB, C) avg-pool

        # Linear(2C, 1024) with BN1 folded in.  Contraction split into the
        # [max | avg] halves == the concat, without materializing (TB, 2C).
        h = jnp.dot(mx.astype(jnp.bfloat16), w1m_ref[...],
                    preferred_element_type=jnp.float32)
        h = h + jnp.dot(av.astype(jnp.bfloat16), w1a_ref[...],
                        preferred_element_type=jnp.float32)
        h = h + b1_ref[...]
        h = jnp.maximum(h, 0.0)                             # ReLU; Dropout = identity

        # Linear(1024, num_classes) with BN2 folded in.  Padded class columns have
        # zero weights and a -1e30 bias, so no extra masking is needed below.
        logits = jnp.dot(h.astype(jnp.bfloat16), w2_ref[...],
                         preferred_element_type=jnp.float32) + b2_ref[...]

        # Numerically stable LogSoftmax(dim=1).
        m = jnp.max(logits, axis=-1, keepdims=True)
        z = logits - m
        out_ref[...] = z - jnp.log(jnp.sum(jnp.exp(z), axis=-1, keepdims=True))


# ----------------------------------------------------------------------------
# Parameter construction (mirrors the PyTorch module's shapes / init)
# ----------------------------------------------------------------------------
def init_params(key, encoder_channels, num_classes, hidden=HIDDEN):
    c2 = encoder_channels[0] * 2
    k1, k2, k3, k4 = jax.random.split(key, 4)

    bound1 = 1.0 / math.sqrt(c2)
    w1 = jax.random.uniform(k1, (hidden, c2), jnp.float32, -bound1, bound1)
    b1 = jax.random.uniform(k2, (hidden,), jnp.float32, -bound1, bound1)

    bound2 = 1.0 / math.sqrt(hidden)
    w2 = jax.random.uniform(k3, (num_classes, hidden), jnp.float32, -bound2, bound2)
    b2 = jax.random.uniform(k4, (num_classes,), jnp.float32, -bound2, bound2)

    return {
        "bn1_g": jnp.ones((c2,), jnp.float32),
        "bn1_b": jnp.zeros((c2,), jnp.float32),
        "bn1_m": jnp.zeros((c2,), jnp.float32),
        "bn1_v": jnp.ones((c2,), jnp.float32),
        "w1": w1, "b1": b1,
        "bn2_g": jnp.ones((hidden,), jnp.float32),
        "bn2_b": jnp.zeros((hidden,), jnp.float32),
        "bn2_m": jnp.zeros((hidden,), jnp.float32),
        "bn2_v": jnp.ones((hidden,), jnp.float32),
        "w2": w2, "b2": b2,
    }


def prepare_params(params, num_classes, hidden=HIDDEN, eps=BN_EPS):
    """One-time transform: fold eval-mode BN into the Linears, pre-transpose to
    (in, out), pad classes to 128 lanes (padded bias = -1e30 so the class-padding
    mask is free), and cast matmul weights to bf16."""
    # BN1(x) = x*s1 + t1 folded into Linear1.
    s1 = params["bn1_g"] * jax.lax.rsqrt(params["bn1_v"] + eps)
    t1 = params["bn1_b"] - params["bn1_m"] * s1
    w1t = params["w1"].T                                   # (2C, hidden)
    w1_folded = s1[:, None] * w1t                          # (2C, hidden)
    bias1 = params["b1"] + t1 @ w1t                        # (hidden,)

    # BN2(h) = h*s2 + t2 folded into Linear2.
    s2 = params["bn2_g"] * jax.lax.rsqrt(params["bn2_v"] + eps)
    t2 = params["bn2_b"] - params["bn2_m"] * s2
    w2t = params["w2"].T                                   # (hidden, NC)
    w2_folded = s2[:, None] * w2t
    bias2 = params["b2"] + t2 @ w2t                        # (NC,)

    c = w1_folded.shape[0] // 2
    ncp = max(128, _round_up(num_classes, 128))
    w2_pad = jnp.zeros((hidden, ncp), jnp.float32).at[:, :num_classes].set(w2_folded)
    # -1e30 on padded columns => they never win the max and contribute 0 to the
    # softmax denominator; no per-tile iota/select needed in the kernel.
    b2_pad = jnp.full((ncp,), -1e30, jnp.float32).at[:num_classes].set(bias2)

    return {
        "w1_max": w1_folded[:c].astype(jnp.bfloat16),      # max-pool half (C, hidden)
        "w1_avg": w1_folded[c:].astype(jnp.bfloat16),      # avg-pool half (C, hidden)
        "bias1": bias1.astype(jnp.float32)[None, :],       # (1, hidden)
        "w2": w2_pad.astype(jnp.bfloat16),                 # (hidden, ncp)
        "bias2": b2_pad[None, :],                          # (1, ncp)
        "num_classes": num_classes,
        "padded_classes": ncp,
    }


# ----------------------------------------------------------------------------
# Generation-aware tile / VMEM policy
# ----------------------------------------------------------------------------
def _vmem_limit_bytes():
    cap = 64 << 20                       # conservative default (v7x-sized)
    try:
        cap = int(pltpu.get_tpu_info().vmem_capacity_bytes)
    except Exception:
        pass
    # ~75% of physical VMEM, capped at 100 MiB: ~96 MiB on v5e/v6e (128 MiB parts),
    # ~48 MiB on v7x (64 MiB parts).
    return max(16 << 20, min((cap * 3) // 4, 100 << 20))


def _fixed_vmem_bytes(tb, C, hidden, ncp):
    # bf16 weights (conservatively counted double-buffered) + f32 biases.
    weights = 2 * ((2 * C * hidden + hidden * ncp) * 2 + (hidden + ncp) * 4)
    out = 2 * tb * ncp * 4                                  # double-buffered output
    scratch = 2 * tb * C * 4                                # max/sum accumulators
    epilogue = tb * (hidden + 2 * ncp + 2 * C) * 4          # h / logits / pooled temps
    return weights + out + scratch + epilogue + (2 << 20)   # + slack


def _choose_tiles(B, C, HW, x_bytes, hidden, ncp, vmem_limit, batch_tile, hw_tile):
    """Pick (TB, hw_tile) from an explicit VMEM budget."""
    Bp8 = _round_up(max(B, 1), 8)
    if Bp8 > batch_tile:
        # Largest multiple-of-8 divisor of the 8-padded batch that fits the tile
        # cap: zero extra batch padding, nb >= 2.
        tb0 = max(d for d in range(8, batch_tile + 1, 8) if Bp8 % d == 0)
    elif Bp8 >= 16 and Bp8 % 16 == 0:
        # Two batch tiles so the "parallel" axis shards across v7x's 2 TCs,
        # without adding padded rows to the HBM stream.
        tb0 = Bp8 // 2
    else:
        tb0 = Bp8                        # single small tile; never pad up to 128 rows

    if (hw_tile is not None and HW % hw_tile == 0
            and (hw_tile % 128 == 0 or hw_tile == HW)):
        hw_cands = [hw_tile]
    else:
        hw_cands = sorted(
            {HW} | {k * 128 for k in range(1, HW // 128 + 1) if HW % (k * 128) == 0},
            reverse=True)

    # Per hw element of the x tile: double-buffered native-dtype stream plus the
    # in-kernel f32 upcast used for the max/sum reduction.
    per_elem = 2 * x_bytes + 4

    tb_cands, t = [], tb0
    while True:
        tb_cands.append(t)
        if t <= 8:
            break
        t = max(8, _round_up(t // 2, 8))

    for tb in tb_cands:
        budget = vmem_limit - _fixed_vmem_bytes(tb, C, hidden, ncp)
        for hw in hw_cands:
            if tb * C * hw * per_elem <= budget:
                return tb, hw
    return tb_cands[-1], hw_cands[-1]    # nothing fits the budget; smallest tiles


# ----------------------------------------------------------------------------
# Forward wrapper
# ----------------------------------------------------------------------------
def simplenet_head_forward(x_nchw, prep, *, batch_tile=128, hw_tile=None):
    B, C, H, W = x_nchw.shape
    HW = H * W
    num_classes = prep["num_classes"]
    ncp = prep["padded_classes"]
    hidden = prep["w2"].shape[0]

    # Stream the activation in the caller's native dtype (bf16 recommended).
    x = x_nchw.reshape(B, C, HW)
    ebytes = x.dtype.itemsize

    vmem_limit = _vmem_limit_bytes()
    TB, hw_tile = _choose_tiles(B, C, HW, ebytes, hidden, ncp,
                                vmem_limit, batch_tile, hw_tile)

    Bp = _round_up(_round_up(max(B, 1), 8), TB)
    if Bp != B:
        # Zero pad: padded rows produce finite garbage that is sliced off below.
        x = jnp.pad(x, ((0, Bp - B), (0, 0), (0, 0)))

    nb = Bp // TB
    nhw = HW // hw_tile

    flops = 2 * Bp * hidden * (2 * C + ncp) + 2 * Bp * C * HW
    bytes_accessed = (Bp * C * HW * ebytes
                      + (prep["w1_max"].size + prep["w1_avg"].size
                         + prep["w2"].size) * 2
                      + (hidden + ncp) * 4
                      + Bp * ncp * 4)
    cost = pl.CostEstimate(flops=flops, transcendentals=Bp * ncp,
                           bytes_accessed=bytes_accessed)

    kernel = functools.partial(simplenet_head_kernel, hw_total=HW)

    out_padded = pl.pallas_call(
        kernel,
        out_shape=jax.ShapeDtypeStruct((Bp, ncp), jnp.float32),
        grid_spec=pltpu.PrefetchScalarGridSpec(
            num_scalar_prefetch=0,
            grid=(nb, nhw),
            in_specs=[
                pl.BlockSpec((TB, C, hw_tile), lambda i, j: (i, 0, j)),   # x
                pl.BlockSpec((C, hidden), lambda i, j: (0, 0)),           # w1_max
                pl.BlockSpec((C, hidden), lambda i, j: (0, 0)),           # w1_avg
                pl.BlockSpec((1, hidden), lambda i, j: (0, 0)),           # bias1
                pl.BlockSpec((hidden, ncp), lambda i, j: (0, 0)),         # w2
                pl.BlockSpec((1, ncp), lambda i, j: (0, 0)),              # bias2
            ],
            out_specs=pl.BlockSpec((TB, ncp), lambda i, j: (i, 0)),
            scratch_shapes=[
                pltpu.VMEM((TB, C), jnp.float32),   # running max
                pltpu.VMEM((TB, C), jnp.float32),   # running sum
            ],
        ),
        compiler_params=pltpu.CompilerParams(
            dimension_semantics=("parallel", "arbitrary"),
            vmem_limit_bytes=int(vmem_limit),
        ),
        cost_estimate=cost,
    )(x, prep["w1_max"], prep["w1_avg"], prep["bias1"], prep["w2"], prep["bias2"])

    return out_padded[:B, :num_classes]


# ----------------------------------------------------------------------------
# Pure-JAX reference (unfolded, f32) for correctness
# ----------------------------------------------------------------------------
def reference_forward(x_nchw, params):
    B, C, H, W = x_nchw.shape
    xf = x_nchw.reshape(B, C, H * W)
    pooled = jnp.concatenate([jnp.max(xf, -1), jnp.mean(xf, -1)], axis=-1)
    y = (pooled - params["bn1_m"]) / jnp.sqrt(params["bn1_v"] + BN_EPS)
    y = y * params["bn1_g"] + params["bn1_b"]
    h = y @ params["w1"].T + params["b1"]
    h = jnp.maximum(h, 0.0)
    h = (h - params["bn2_m"]) / jnp.sqrt(params["bn2_v"] + BN_EPS)
    h = h * params["bn2_g"] + params["bn2_b"]
    logits = h @ params["w2"].T + params["b2"]
    return jax.nn.log_softmax(logits, axis=-1)


if __name__ == "__main__":
    # Small shapes consistent with the module: feats[0] is (B, C, H, W).
    B, C, H, W = 2, 4, 16, 16
    num_classes = 10
    encoder_channels = [C]

    key = jax.random.PRNGKey(0)
    k_x, k_p = jax.random.split(key)
    x_f32 = jax.random.normal(k_x, (B, C, H, W), jnp.float32)
    x = x_f32.astype(jnp.bfloat16)   # activations streamed in their native bf16

    params = init_params(k_p, encoder_channels, num_classes)
    prep = prepare_params(params, num_classes)   # one-time BN fold / transpose / bf16

    # hw_tile=128 so the small test exercises the multi-step HW reduction path.
    out = simplenet_head_forward(x, prep, hw_tile=128)
    out = jax.block_until_ready(out)

    ref = reference_forward(x.astype(jnp.float32), params)
    assert out.shape == (B, num_classes)
    # bf16 matmul weights vs a pure-f32 reference => relaxed tolerance.
    assert jnp.allclose(out, ref, atol=2e-2, rtol=2e-2), "mismatch vs JAX reference"

    # TODO(synk): module default last_activation='Softmax' raises ValueError in the
    # PyTorch __init__; this implementation uses last_activation='LogSoftmax'.
    # TODO(synk): metric_branch=True (ArcMarginProduct) path not implemented.
    print("KERNEL_OK")
</pallas_src>

<mosaic_0001>
module attributes {stable_mosaic.version = 11 : i64} {
  func.func @simplenet_head_kernel(%arg0: i32, %arg1: i32, %arg2: memref<8x4x128xbf16, #tpu.memory_space<vmem>>, %arg3: memref<4x1024xbf16, #tpu.memory_space<vmem>>, %arg4: memref<4x1024xbf16, #tpu.memory_space<vmem>>, %arg5: memref<1x1024xf32, #tpu.memory_space<vmem>>, %arg6: memref<1024x128xbf16, #tpu.memory_space<vmem>>, %arg7: memref<1x128xf32, #tpu.memory_space<vmem>>, %arg8: memref<8x128xf32, #tpu.memory_space<vmem>>, %arg9: memref<8x4xf32, #tpu.memory_space<vmem>>, %arg10: memref<8x4xf32, #tpu.memory_space<vmem>>) attributes {dimension_semantics = [#tpu.dimension_semantics<parallel>, #tpu.dimension_semantics<arbitrary>], iteration_bounds = array<i64: 1, 2>, scalar_prefetch = 0 : i64, scratch_operands = 2 : i64, tpu.core_type = #tpu.core_type<tc>, window_params = [{transform_indices = @transform_0, window_bounds = array<i64: 8, 4, 128>}, {pipeline_mode = #tpu.pipeline_mode<synchronous>, transform_indices = @transform_1, window_bounds = array<i64: 4, 1024>}, {pipeline_mode = #tpu.pipeline_mode<synchronous>, transform_indices = @transform_2, window_bounds = array<i64: 4, 1024>}, {pipeline_mode = #tpu.pipeline_mode<synchronous>, transform_indices = @transform_3, window_bounds = array<i64: 1, 1024>}, {pipeline_mode = #tpu.pipeline_mode<synchronous>, transform_indices = @transform_4, window_bounds = array<i64: 1024, 128>}, {pipeline_mode = #tpu.pipeline_mode<synchronous>, transform_indices = @transform_5, window_bounds = array<i64: 1, 128>}, {transform_indices = @transform_6, window_bounds = array<i64: 8, 128>}]} {
    %c0_i32 = arith.constant 0 : i32
    %0 = arith.cmpi eq, %arg1, %c0_i32 : i32
    %1 = arith.extui %0 : i1 to i32
    %c0_i32_0 = arith.constant 0 : i32
    %2 = arith.cmpi ne, %1, %c0_i32_0 : i32
    scf.if %2 {
      %cst_13 = arith.constant 0xFF800000 : f32
      %16 = vector.broadcast %cst_13 : f32 to vector<8x4xf32>
      %c0_14 = arith.constant 0 : index
      %c0_15 = arith.constant 0 : index
      %17 = vector.load %arg9[%c0_14, %c0_15] : memref<8x4xf32, #tpu.memory_space<vmem>>, vector<8x4xf32>
      tpu.vector_store %arg9[%c0_14, %c0_15], %16 {strides = array<i32>} : memref<8x4xf32, #tpu.memory_space<vmem>>, vector<8x4xf32>,
      %cst_16 = arith.constant 0.000000e+00 : f32
      %18 = vector.broadcast %cst_16 : f32 to vector<8x4xf32>
      %c0_17 = arith.constant 0 : index
      %c0_18 = arith.constant 0 : index
      %19 = vector.load %arg10[%c0_17, %c0_18] : memref<8x4xf32, #tpu.memory_space<vmem>>, vector<8x4xf32>
      tpu.vector_store %arg10[%c0_17, %c0_18], %18 {strides = array<i32>} : memref<8x4xf32, #tpu.memory_space<vmem>>, vector<8x4xf32>,
    } else {
    }
    %c0 = arith.constant 0 : index
    %c0_1 = arith.constant 0 : index
    %c0_2 = arith.constant 0 : index
    %3 = vector.load %arg2[%c0, %c0_1, %c0_2] : memref<8x4x128xbf16, #tpu.memory_space<vmem>>, vector<8x4x128xbf16>
    %4 = arith.extf %3 : vector<8x4x128xbf16> to vector<8x4x128xf32>
    %c0_3 = arith.constant 0 : index
    %c0_4 = arith.constant 0 : index
    %5 = vector.load %arg9[%c0_3, %c0_4] : memref<8x4xf32, #tpu.memory_space<vmem>>, vector<8x4xf32>
    %cst = arith.constant dense<0xFF800000> : vector<8x4xf32>
    %6 = vector.multi_reduction <maximumf>, %4, %cst [2] : vector<8x4x128xf32> to vector<8x4xf32>
    %7 = arith.maximumf %5, %6 : vector<8x4xf32>
    %c0_5 = arith.constant 0 : index
    %c0_6 = arith.constant 0 : index
    %8 = vector.load %arg9[%c0_5, %c0_6] : memref<8x4xf32, #tpu.memory_space<vmem>>, vector<8x4xf32>
    tpu.vector_store %arg9[%c0_5, %c0_6], %7 {strides = array<i32>} : memref<8x4xf32, #tpu.memory_space<vmem>>, vector<8x4xf32>,
    %c0_7 = arith.constant 0 : index
    %c0_8 = arith.constant 0 : index
    %9 = vector.load %arg10[%c0_7, %c0_8] : memref<8x4xf32, #tpu.memory_space<vmem>>, vector<8x4xf32>
    %cst_9 = arith.constant dense<0.000000e+00> : vector<8x4xf32>
    %10 = vector.multi_reduction <add>, %4, %cst_9 [2] : vector<8x4x128xf32> to vector<8x4xf32>
    %11 = arith.addf %9, %10 : vector<8x4xf32>
    %c0_10 = arith.constant 0 : index
    %c0_11 = arith.constant 0 : index
    %12 = vector.load %arg10[%c0_10, %c0_11] : memref<8x4xf32, #tpu.memory_space<vmem>>, vector<8x4xf32>
    tpu.vector_store %arg10[%c0_10, %c0_11], %11 {strides = array<i32>} : memref<8x4xf32, #tpu.memory_space<vmem>>, vector<8x4xf32>,
    %c1_i32 = arith.constant 1 : i32
    %13 = arith.cmpi eq, %arg1, %c1_i32 : i32
    %14 = arith.extui %13 : i1 to i32
    %c0_i32_12 = arith.constant 0 : i32
    %15 = arith.cmpi ne, %14, %c0_i32_12 : i32
    scf.if %15 {
      %c0_13 = arith.constant 0 : index
      %c0_14 = arith.constant 0 : index
      %16 = vector.load %arg9[%c0_13, %c0_14] : memref<8x4xf32, #tpu.memory_space<vmem>>, vector<8x4xf32>
      %c0_15 = arith.constant 0 : index
      %c0_16 = arith.constant 0 : index
      %17 = vector.load %arg10[%c0_15, %c0_16] : memref<8x4xf32, #tpu.memory_space<vmem>>, vector<8x4xf32>
      %cst_17 = arith.constant 3.906250e-03 : f32
      %18 = vector.broadcast %cst_17 : f32 to vector<8x4xf32>
      %19 = arith.mulf %17, %18 : vector<8x4xf32>
      %20 = arith.truncf %16 : vector<8x4xf32> to vector<8x4xbf16>
      %c0_18 = arith.constant 0 : index
      %c0_19 = arith.constant 0 : index
      %21 = vector.load %arg3[%c0_18, %c0_19] : memref<4x1024xbf16, #tpu.memory_space<vmem>>, vector<4x1024xbf16>
      %cst_20 = arith.constant dense<0.000000e+00> : vector<8x1024xf32>
      %22 = tpu.matmul %20, %21, %cst_20 {dimension_numbers = #tpu.dot_dimension_numbers<[1], [0], [0], [1], [0, 0, 1, 1], [], []>} : vector<8x4xbf16>, vector<4x1024xbf16>, vector<8x1024xf32> -> vector<8x1024xf32>
      %23 = arith.truncf %19 : vector<8x4xf32> to vector<8x4xbf16>
      %c0_21 = arith.constant 0 : index
      %c0_22 = arith.constant 0 : index
      %24 = vector.load %arg4[%c0_21, %c0_22] : memref<4x1024xbf16, #tpu.memory_space<vmem>>, vector<4x1024xbf16>
      %cst_23 = arith.constant dense<0.000000e+00> : vector<8x1024xf32>
      %25 = tpu.matmul %23, %24, %cst_23 {dimension_numbers = #tpu.dot_dimension_numbers<[1], [0], [0], [1], [0, 0, 1, 1], [], []>} : vector<8x4xbf16>, vector<4x1024xbf16>, vector<8x1024xf32> -> vector<8x1024xf32>
      %26 = arith.addf %22, %25 : vector<8x1024xf32>
      %c0_24 = arith.constant 0 : index
      %c0_25 = arith.constant 0 : index
      %27 = vector.load %arg5[%c0_24, %c0_25] : memref<1x1024xf32, #tpu.memory_space<vmem>>, vector<1x1024xf32>
      %28 = vector.broadcast %27 : vector<1x1024xf32> to vector<8x1024xf32>
      %29 = arith.addf %26, %28 : vector<8x1024xf32>
      %cst_26 = arith.constant 0.000000e+00 : f32
      %30 = vector.broadcast %cst_26 : f32 to vector<8x1024xf32>
      %31 = arith.maximumf %29, %30 : vector<8x1024xf32>
      %32 = arith.truncf %31 : vector<8x1024xf32> to vector<8x1024xbf16>
      %c0_27 = arith.constant 0 : index
      %c0_28 = arith.constant 0 : index
      %33 = vector.load %arg6[%c0_27, %c0_28] : memref<1024x128xbf16, #tpu.memory_space<vmem>>, vector<1024x128xbf16>
      %cst_29 = arith.constant dense<0.000000e+00> : vector<8x128xf32>
      %34 = tpu.matmul %32, %33, %cst_29 {dimension_numbers = #tpu.dot_dimension_numbers<[1], [0], [0], [1], [0, 0, 1, 1], [], []>} : vector<8x1024xbf16>, vector<1024x128xbf16>, vector<8x128xf32> -> vector<8x128xf32>
      %c0_30 = arith.constant 0 : index
      %c0_31 = arith.constant 0 : index
      %35 = vector.load %arg7[%c0_30, %c0_31] : memref<1x128xf32, #tpu.memory_space<vmem>>, vector<1x128xf32>
      %36 = vector.broadcast %35 : vector<1x128xf32> to vector<8x128xf32>
      %37 = arith.addf %34, %36 : vector<8x128xf32>
      %cst_32 = arith.constant dense<0xFF800000> : vector<8xf32>
      %38 = vector.multi_reduction <maximumf>, %37, %cst_32 [1] : vector<8x128xf32> to vector<8xf32>
      %39 = vector.shape_cast %38 : vector<8xf32> to vector<8x1xf32>
      %40 = vector.broadcast %39 : vector<8x1xf32> to vector<8x128xf32>
      %41 = arith.subf %37, %40 : vector<8x128xf32>
      %42 = math.exp %41 : vector<8x128xf32>
      %cst_33 = arith.constant dense<0.000000e+00> : vector<8xf32>
      %43 = vector.multi_reduction <add>, %42, %cst_33 [1] : vector<8x128xf32> to vector<8xf32>
      %44 = vector.shape_cast %43 : vector<8xf32> to vector<8x1xf32>
      %45 = math.log %44 : vector<8x1xf32>
      %46 = vector.broadcast %45 : vector<8x1xf32> to vector<8x128xf32>
      %47 = arith.subf %41, %46 : vector<8x128xf32>
      %c0_34 = arith.constant 0 : index
      %c0_35 = arith.constant 0 : index
      %48 = vector.load %arg8[%c0_34, %c0_35] : memref<8x128xf32, #tpu.memory_space<vmem>>, vector<8x128xf32>
      tpu.vector_store %arg8[%c0_34, %c0_35], %47 {strides = array<i32>} : memref<8x128xf32, #tpu.memory_space<vmem>>, vector<8x128xf32>,
    } else {
    }
    return
  }
  func.func @transform_0(%arg0: i32, %arg1: i32) -> (i32, i32, i32) {
    %c0_i32 = arith.constant 0 : i32
    %c0_i32_0 = arith.constant 0 : i32
    return %arg0, %c0_i32, %arg1 : i32, i32, i32
  }
  func.func @transform_1(%arg0: i32, %arg1: i32) -> (i32, i32) {
    %c0_i32 = arith.constant 0 : i32
    %c0_i32_0 = arith.constant 0 : i32
    %c0_i32_1 = arith.constant 0 : i32
    return %c0_i32, %c0_i32_0 : i32, i32
  }
  func.func @transform_2(%arg0: i32, %arg1: i32) -> (i32, i32) {
    %c0_i32 = arith.constant 0 : i32
    %c0_i32_0 = arith.constant 0 : i32
    %c0_i32_1 = arith.constant 0 : i32
    return %c0_i32, %c0_i32_0 : i32, i32
  }
  func.func @transform_3(%arg0: i32, %arg1: i32) -> (i32, i32) {
    %c0_i32 = arith.constant 0 : i32
    %c0_i32_0 = arith.constant 0 : i32
    %c0_i32_1 = arith.constant 0 : i32
    return %c0_i32, %c0_i32_0 : i32, i32
  }
  func.func @transform_4(%arg0: i32, %arg1: i32) -> (i32, i32) {
    %c0_i32 = arith.constant 0 : i32
    %c0_i32_0 = arith.constant 0 : i32
    %c0_i32_1 = arith.constant 0 : i32
    return %c0_i32, %c0_i32_0 : i32, i32
  }
  func.func @transform_5(%arg0: i32, %arg1: i32) -> (i32, i32) {
    %c0_i32 = arith.constant 0 : i32
    %c0_i32_0 = arith.constant 0 : i32
    %c0_i32_1 = arith.constant 0 : i32
    return %c0_i32, %c0_i32_0 : i32, i32
  }
  func.func @transform_6(%arg0: i32, %arg1: i32) -> (i32, i32) {
    %c0_i32 = arith.constant 0 : i32
    %c0_i32_0 = arith.constant 0 : i32
    return %arg0, %c0_i32 : i32, i32
  }
}

</mosaic_0001>

<bundles_post_ra>
// kernel: tpu_custom_call.1
= control target key start
LH: loop header
LB: loop body
LE: loop exit
PB: predicated region body
PF: predicated region fallthrough
CT: control target
= control target key end

     0   :  { %s2565_s0 = inlined_call_operand.hbm [shape: bf16[8,4,256], index: 0, kind: input, shape index: {}]   ;;  %s2566_s1 = inlined_call_operand.hbm [shape: bf16[4,1024], index: 1, kind: input, shape index: {}]   ;;  %s2567_s2 = inlined_call_operand.hbm [shape: bf16[4,1024], index: 2, kind: input, shape index: {}]   ;;  %s2568_s3 = inlined_call_operand.hbm [shape: f32[1,1024], index: 3, kind: input, shape index: {}]   ;;  %s2569_s4 = inlined_call_operand.hbm [shape: bf16[1024,128], index: 4, kind: input, shape index: {}]   ;;  %s2570_s5 = inlined_call_operand.vmem [shape: f32[1,128], index: 5, kind: input, shape index: {}]   ;;  %s2571_s6 = inlined_call_operand.hbm [shape: f32[8,128], index: 6, kind: output, shape index: {}]  }
   0x1   :  { %2574 = sst [smem:[#allocation18_spill]] %s2566_s1 }
   0x2   :  { %11 = vsyncpa [#allocation5], 0 }
   0x3   :  { %13 = vsyncpa [#allocation5 + $0x1], 0 }
   0x4   :  { %14 = vsyncpa [#allocation8], 0 }
   0x5   :  { %15 = vsyncpa [#allocation11], 0 }
   0x6   :  { %16 = vsyncpa [#allocation6], 0  ;;  %s2309_s21 = smov 0   ;;  %s2311_s22 = smov 0  }
   0x7   :  { %s2313_s23 = smov 0   ;;  %s2315_s24 = smov 0  }
   0x8   :  { %s2317_s25 = smov 0   ;;  %s2319_s26 = smov 0  }
   0x9 LB: > { %s2572_s27 = sadd.s32 4294967295, %s2261_s26   ;;  %p56_p0 = scmp.ne.s32.totalorder %s2245_s22, %s2241_s21  ;;  %s2261_s26 = sphi %s2319_s26, %s22_s26   ;;  %s2257_s25 = sphi %s2317_s25, %s2587_s25   ;;  %s2253_s24 = sphi %s2315_s24, %s2586_s24   ;;  %s2249_s23 = sphi %s2313_s23, %s2585_s23   ;;  %s2245_s22 = sphi %s2311_s22, %s2584_s22   ;;  %s2241_s21 = sphi %s2309_s21, %s2583_s21  }
   0xa   : > { %p2341_p1 = scmp.eq.s32.totalorder %s2572_s27, 0  ;;  %p1551_p2 = scmp.ge.s32.totalorder %s2261_s26, 1 }
   0xb   : > { %p198_p3 = scmp.lt.s32.totalorder %s2261_s26, 3  ;;  %s2577_s1 = sld [smem:[#allocation18_spill]] }
   0xc   : > { %p2349_p4 = por %p2341_p1, %p56_p0  ;;  %s2263_s10 = smov [#allocation7]  }
   0xd   : > { %p2356_p5 = pnand %p1551_p2, %p198_p3  ;;  %s212_s11 = sshll.u32 %s2263_s10, 4  ;;  %s213_s11 = int_to_ptr.vmem [resolvable:$true] %s212_s11 }
   0xe   : > { %s234_s14 = sshll.u32 %s2568_s3, 4  ;;  %s222_s18 = sshll.u32 %s2567_s2, 4  ;;  %s235_s14 = int_to_ptr.hbm [resolvable:$true] %s234_s14  ;;  %s223_s18 = int_to_ptr.hbm [resolvable:$true] %s222_s18 }
   0xf   : > { %p1929_p6 = pneg %p2356_p5  ;;  %s2264_s19 = smov [#allocation10]  }
  0x10   : > { %s236_s20 = sshll.u32 %s2264_s19, 4  ;;  %s245_s7 = sshll.u32 %s2569_s4, 4  ;;  %s237_s20 = int_to_ptr.vmem [resolvable:$true] %s236_s20  ;;  %s246_s7 = int_to_ptr.hbm [resolvable:$true] %s245_s7 }
  0x11   : > { %s210_s8 = sshll.u32 %s2577_s1, 4  ;;  %p2367_p7 = pnand %p1929_p6, %p2341_p1  ;;  %s211_s8 = int_to_ptr.hbm [resolvable:$true] %s210_s8 }
  0x12   : > { %s2265_s10 = smov [#allocation9]   ;;  %s2573_s13 = smov 64  }
  0x13   : > { %1932 = dma.hbm_to_vmem [thread:$0]  (!%p2367_p7), %s211_s8, 256, %s213_s11, [#allocation8]  }
  0x14   : > { %1938 = dma.hbm_to_vmem [thread:$0]  (!%p2367_p7), %s235_s14, 128, %s237_s20, [#allocation11]  }
  0x15   : > { %s224_s12 = sshll.u32 %s2265_s10, 4  ;;  %s2266_s8 = smov [#allocation12]   ;;  %s225_s12 = int_to_ptr.vmem [resolvable:$true] %s224_s12 }
  0x16   : > { %1935 = dma.hbm_to_vmem [thread:$0]  (!%p2367_p7), %s223_s18, 256, %s225_s12, [#allocation8]  }
  0x17   : > { %s247_s11 = sshll.u32 %s2266_s8, 4  ;;  %s2268_s14 = smov 4   ;;  %s248_s11 = int_to_ptr.vmem [resolvable:$true] %s247_s11 }
  0x18   : > { %1941 = dma.hbm_to_vmem [thread:$0]  (!%p2367_p7), %s246_s7, 8192, %s248_s11, [#allocation11], %s2573_s13, %s2573_s13, %s2268_s14  }
  0x19   : > { %s31_s16 = sadd.s32 1, %s2257_s25  ;;  %s43_s17 = sadd.s32 1, %s2249_s23 }
  0x1a   : > { %p32_p8 = scmp.ge.s32.totalorder %s31_s16, 2  ;;  %p50_p9 = scmp.ne.s32.totalorder %s2249_s23, %s2245_s22 }
  0x1b   : > { %p51_p10 = scmp.eq.s32.totalorder %s2261_s26, 0  ;;  %p1950_p11 = scmp.lt.s32.totalorder %s2261_s26, 2 }
  0x1c   : > { %s2589_s16 = smov (%p32_p8, %s31_s16), 0  ;;  %s264_s19 = sand.u32 1, %s2249_s23  }
  0x1d   : > { %p2395_p12 = por %p51_p10, %p50_p9  ;;  %s39_s15 = ssub.s32 %s2257_s25, %s2589_s16 }
  0x1e   : > { %p41_p13 = scmp.eq.s32.totalorder %s39_s15, 0  ;;  %s1557_s20 = sshll.u32 %s264_s19, 4 }
  0x1f   : > { %s1558_s21 = sshll.u32 %s2257_s25, 1  ;;  %s268_s8 = scalar_lea.vmem [#allocation4], %s1557_s20 }
  0x20   : > { %s2404_s30 = scalar_select %p41_p13, %s2249_s23, %s43_s17  }
  0x21   : > { %s275_s12 = scalar_lea.hbm %s2565_s0, %s1558_s21  ;;  %s278_s11 = sshll.u32 %s268_s8, 4  ;;  %s279_s11 = int_to_ptr.vmem [resolvable:$true] %s278_s11 }
  0x22   : > { %s276_s14 = sshll.u32 %s275_s12, 4  ;;  %p1943_p0 = pnand %p1950_p11, %p2395_p12  ;;  %s277_s14 = int_to_ptr.hbm [resolvable:$true] %s276_s14 }
  0x23   : > { %s265_s27 = scalar_lea.sflag [#allocation5], %s264_s19  ;;  %s2269_s13 = smov 32  }
  0x24   : > { %s2270_s1 = smov 2   ;;  %s2581_s15 = smov 64  }
  0x25   : > { %1945 = dma.hbm_to_vmem [thread:$0]  (!%p1943_p0), %s277_s14, 256, %s279_s11, %s265_s27, %s2581_s15, %s2269_s13, %s2270_s1  }
  0x26   : > { %290 = sbr.rel (%p2356_p5) target bundleno = 823 (0x337), region = 44  ;;  %s292_s17 = sand.u32 (!%p2356_p5), 1, %s2245_s22  }
  0x27   : > { %s1560_s21 = sshll.u32 (!%p2356_p5), %s292_s17, 4  ;;  %s293_s20 = scalar_lea.sflag (!%p2356_p5), [#allocation5], %s292_s17 }
  0x28   : > { %s2417_s7 = scalar_lea.vmem (!%p2356_p5), [#allocation4], %s1560_s21 }
  0x2b   : > { %2224 = dma.done.wait (%p2349_p4), %s293_s20, 256  }
  0x2c   : > { %2226 = vsyncadd (%p2349_p4), %s293_s20, 4294967040 }
  0x2d   : > { %2228 = dma.done.wait (%p2341_p1), [#allocation8], 512  }
  0x2e   : > { %2230 = vsyncadd (%p2341_p1), [#allocation8], 4294966784 }
  0x2f   : > { %2232 = dma.done.wait (%p2341_p1), [#allocation11], 8320  }
  0x30   : > { %2234 = vsyncadd (%p2341_p1), [#allocation11], 4294958976  ;;  %p1565_p2 = scmp.ne.s32.totalorder %s2253_s24, 0 }
  0x32   : > { %346 = sbr.rel (%p1565_p2) target bundleno = 58 (0x3a), region = 68 }
  0x37   : > { %vm347_vm0 = vcmask 31744   ;;  %v2271_v0 = vmov -inf   ;;  %v2272_v1 = vmov 0.0  }
  0x38   : > { %348 = vst.msk [vmem:[#allocation2] sm:$0xff] %vm347_vm0, %v2271_v0 }
  0x39   : > { %349 = vst.msk [vmem:[#allocation3] sm:$0xff] %vm347_vm0, %v2272_v1 }
  0x3a PF: > { %v350_v2 = vld [vmem:[%s2417_s7] sm:$0x3]  ;;  %vm367_vm1 = vcmask 1043456   ;;  %v352_v3 = vld [vmem:[%s2417_s7 + $0x4] sm:$0x3]  ;;  %v400_v40 = vlaneseq  ;;  %vm410_vm2 = vcmask 1041409  }
  0x3b   : > { %v358_v4 = vunpack.c.l.bf16 %v350_v2  ;;  %v360_v5 = vunpack.c.l.bf16 %v352_v3  ;;  %v351_v6 = vld [vmem:[%s2417_s7 + $0x2] sm:$0x3]  ;;  %v353_v14 = vld [vmem:[%s2417_s7 + $0x6] sm:$0x3]  ;;  %v354_v15 = vld [vmem:[%s2417_s7 + $0x8] sm:$0x3] }
  0x3c   : > { %v359_v10 = vunpack.c.l.bf16 %v351_v6  ;;  %v361_v16 = vunpack.c.l.bf16 %v353_v14  ;;  %v362_v17 = vunpack.c.l.bf16 %v354_v15  ;;  %v355_v21 = vld [vmem:[%s2417_s7 + $0xa] sm:$0x3]  ;;  %v356_v26 = vld [vmem:[%s2417_s7 + $0xc] sm:$0x3]  ;;  %v357_v27 = vld [vmem:[%s2417_s7 + $0xe] sm:$0x3] }
  0x3d   : > { %v429_v7 = vsel %vm367_vm1, %v358_v4, 0.0  ;;  %v368_v8 = vsel %vm367_vm1, %v358_v4, -inf  ;;  %v374_v9 = vsel %vm367_vm1, %v360_v5, -inf  ;;  %v435_v13 = vsel %vm367_vm1, %v360_v5, 0.0  ;;  %p1566_p1 = scmp.ne.s32.totalorder %s2253_s24, 1 }
  0x3e   : > { %430 = vadd.xlane.f32.xlu1 %v429_v7  ;;  %369 = vmax.xlane.f32.xlu0 %v368_v8  ;;  %v432_v11 = vsel %vm367_vm1, %v359_v10, 0.0  ;;  %v371_v12 = vsel %vm367_vm1, %v359_v10, -inf  ;;  %v438_v18 = vsel %vm367_vm1, %v361_v16, 0.0  ;;  %v377_v19 = vsel %vm367_vm1, %v361_v16, -inf }
  0x3f   : > { %375 = vmax.xlane.f32.xlu2 %v374_v9  ;;  %v380_v20 = vsel %vm367_vm1, %v362_v17, -inf  ;;  %v363_v22 = vunpack.c.l.bf16 %v355_v21  ;;  %v441_v24 = vsel %vm367_vm1, %v362_v17, 0.0  ;;  %v364_v28 = vunpack.c.l.bf16 %v356_v26  ;;  %v366_v4 = vld [vmem:[#allocation2] sm:$0xff] }
  0x40   : > { %v365_v29 = vunpack.c.l.bf16 %v357_v27  ;;  %v401_v44 = vand.u32 127, %v400_v40  ;;  %vm412_vm3 = vcmask 1042434   ;;  %vm414_vm4 = vcmask 1043459   ;;  %v428_v17 = vld [vmem:[#allocation3] sm:$0xff] }
  0x41   : > { %v383_v23 = vsel %vm367_vm1, %v363_v22, -inf  ;;  %v444_v25 = vsel %vm367_vm1, %v363_v22, 0.0  ;;  %v447_v30 = vsel %vm367_vm1, %v364_v28, 0.0  ;;  %v386_v31 = vsel %vm367_vm1, %v364_v28, -inf }
  0x42   : > { %v389_v32 = vsel %vm367_vm1, %v365_v29, -inf  ;;  %v450_v33 = vsel %vm367_vm1, %v365_v29, 0.0  ;;  %vm416_vm5 = vcmask 1044484   ;;  %vm418_vm6 = vcmask 1045509  }
  0x43   : > { %vm420_vm7 = vcmask 1046534   ;;  %vm422_vm8 = vcmask 1047559   ;;  %vm426_vm9 = vcmask 31744  }
  0x46   : > { %433 = vadd.xlane.f32.xlu1 %v432_v11  ;;  %372 = vmax.xlane.f32.xlu0 %v371_v12 }
  0x47   : > { %436 = vadd.xlane.f32.xlu2 %v435_v13 }
  0x4e   : > { %439 = vadd.xlane.f32.xlu1 %v438_v18  ;;  %378 = vmax.xlane.f32.xlu0 %v377_v19 }
  0x4f   : > { %381 = vmax.xlane.f32.xlu2 %v380_v20 }
  0x56   : > { %384 = vmax.xlane.f32.xlu1 %v383_v23  ;;  %442 = vadd.xlane.f32.xlu0 %v441_v24 }
  0x57   : > { %445 = vadd.xlane.f32.xlu2 %v444_v25 }
  0x5e   : > { %448 = vadd.xlane.f32.xlu1 %v447_v30  ;;  %387 = vmax.xlane.f32.xlu0 %v386_v31 }
  0x5f   : > { %390 = vmax.xlane.f32.xlu2 %v389_v32 }
  0x66   : > { %451 = vadd.xlane.f32.xlu0 %v450_v33 }
  0xb1   : > { %v431_v34 = vpop.xlane.xlu1 %430  ;;  %v370_v35 = vpop.xlane.xlu0 %369 }
  0xb2   : > { %v376_v36 = vpop.xlane.xlu2 %375  ;;  %v402_v46 = vperm.slane %v370_v35, %v401_v44  ;;  %v461_v53 = vperm.slane %v431_v34, %v401_v44 }
  0xb3   : > { %v404_v48 = vperm.slane %v376_v36, %v401_v44 }
  0xb9   : > { %v434_v37 = vpop.xlane.xlu1 %433  ;;  %v373_v38 = vpop.xlane.xlu0 %372 }
  0xba   : > { %v437_v39 = vpop.xlane.xlu2 %436  ;;  %v403_v45 = vperm.slane %v373_v38, %v401_v44  ;;  %v462_v54 = vperm.slane %v434_v37, %v401_v44 }
  0xbb   : > { %v463_v59 = vperm.slane %v437_v39, %v401_v44 }
  0xbc   : > { %v411_v51 = vsel %vm410_vm2, %v403_v45, %v402_v46  ;;  %v469_v61 = vsel %vm410_vm2, %v462_v54, %v461_v53 }
  0xbd   : > { %v413_v55 = vsel %vm412_vm3, %v404_v48, %v411_v51  ;;  %v470_v8 = vsel %vm412_vm3, %v463_v59, %v469_v61 }
  0xc1   : > { %v440_v41 = vpop.xlane.xlu1 %439  ;;  %v379_v42 = vpop.xlane.xlu0 %378 }
  0xc2   : > { %v382_v43 = vpop.xlane.xlu2 %381  ;;  %v405_v52 = vperm.slane %v379_v42, %v401_v44  ;;  %v464_v62 = vperm.slane %v440_v41, %v401_v44 }
  0xc3   : > { %v406_v56 = vperm.slane %v382_v43, %v401_v44 }
  0xc4   : > { %v415_v57 = vsel %vm414_vm4, %v405_v52, %v413_v55  ;;  %v471_v10 = vsel %vm414_vm4, %v464_v62, %v470_v8 }
  0xc5   : > { %v417_v63 = vsel %vm416_vm5, %v406_v56, %v415_v57 }
  0xc9   : > { %v443_v47 = vpop.xlane.xlu0 %442  ;;  %v385_v49 = vpop.xlane.xlu1 %384 }
  0xca   : > { %v446_v50 = vpop.xlane.xlu2 %445  ;;  %v407_v58 = vperm.slane %v385_v49, %v401_v44  ;;  %v465_v3 = vperm.slane %v443_v47, %v401_v44 }
  0xcb   : > { %v466_v11 = vperm.slane %v446_v50, %v401_v44 }
  0xcc   : > { %v419_v2 = vsel %vm418_vm6, %v407_v58, %v417_v63  ;;  %v472_v13 = vsel %vm416_vm5, %v465_v3, %v471_v10 }
  0xcd   : > { %v473_v16 = vsel %vm418_vm6, %v466_v11, %v472_v13 }
  0xd1   : > { %v388_v60 = vpop.xlane.xlu0 %387  ;;  %v449_v6 = vpop.xlane.xlu1 %448 }
  0xd2   : > { %v408_v0 = vperm.slane %v388_v60, %v401_v44  ;;  %v391_v1 = vpop.xlane.xlu2 %390  ;;  %v467_v14 = vperm.slane %v449_v6, %v401_v44 }
  0xd3   : > { %v409_v5 = vperm.slane %v391_v1, %v401_v44 }
  0xd4   : > { %v421_v7 = vsel %vm420_vm7, %v408_v0, %v419_v2  ;;  %v474_v19 = vsel %vm420_vm7, %v467_v14, %v473_v16 }
  0xd5   : > { %v423_v9 = vsel %vm422_vm8, %v409_v5, %v421_v7 }
  0xd6   : > { %v425_v12 = vmax.f32 %v366_v4, %v423_v9 }
  0xd8   : > { %427 = vst.msk [vmem:[#allocation2] sm:$0xff] %vm426_vm9, %v425_v12 }
  0xd9   : > { %v452_v15 = vpop.xlane.xlu0 %451 }
  0xda   : > { %v468_v18 = vperm.slane %v452_v15, %v401_v44 }
  0xdb   : > { %482 = sbr.rel (%p1566_p1) target bundleno = 817 (0x331), region = 72 }
  0xdc   : > { %v475_v20 = vsel %vm422_vm8, %v468_v18, %v474_v19 }
  0xdd   : > { %v477_v21 = vadd.f32 %v475_v20, %v428_v17 }
  0xdf   : > { %478 = vst.msk [vmem:[#allocation3] sm:$0xff] %vm426_vm9, %v477_v21 }
  0xe0   : > { %v490_v22 = vld [vmem:[#allocation9] sm:$0xff]  ;;  %v491_v23 = vld [vmem:[#allocation9 + $0x8] sm:$0xff]  ;;  %vm508_vm10 = vcmask 1041408   ;;  %v487_v26 = vld [vmem:[#allocation7] sm:$0xff] }
  0xe1   : > { %493 = vst [vmem:[#allocation1] ss:$4 sm:$0xff] %v490_v22  ;;  %v488_v39 = vld [vmem:[#allocation7 + $0x8] sm:$0xff]  ;;  %v483_v61 = vld [vmem:[#allocation2] sm:$0xff]  ;;  %v1850_v63 = vld [vmem:[#allocation12 + $0x38] sm:$0xff] }
  0xe2   : > { %496 = vst [vmem:[#allocation1 + $0x20] ss:$4 sm:$0xff] %v491_v23  ;;  %v486_v62 = vpack.c.bf16 %v483_v61, %v483_v61  ;;  %v1858_v0 = vld [vmem:[#allocation12 + $0x78] sm:$0xff]  ;;  %v1849_v1 = vld [vmem:[#allocation12 + $0x30] sm:$0xff]  ;;  %v1848_v5 = vld [vmem:[#allocation12 + $0x28] sm:$0xff] }
  0xe3   : > { %v1857_v2 = vld [vmem:[#allocation12 + $0x70] sm:$0xff]  ;;  %v1866_v3 = vld [vmem:[#allocation12 + $0xb8] sm:$0xff]  ;;  %v1856_v6 = vld [vmem:[#allocation12 + $0x68] sm:$0xff] }
  0xe4   : > { %v1874_v4 = vld [vmem:[#allocation12 + $0xf8] sm:$0xff]  ;;  %v1865_v7 = vld [vmem:[#allocation12 + $0xb0] sm:$0xff]  ;;  %v1847_v9 = vld [vmem:[#allocation12 + $0x20] sm:$0xff] }
  0xe5   : > { %v1873_v8 = vld [vmem:[#allocation12 + $0xf0] sm:$0xff]  ;;  %v1855_v10 = vld [vmem:[#allocation12 + $0x60] sm:$0xff]  ;;  %v1864_v11 = vld [vmem:[#allocation12 + $0xa8] sm:$0xff] }
  0xe6   : > { %v484_v24 = vld [vmem:[#allocation3] sm:$0xff]  ;;  %v1872_v12 = vld [vmem:[#allocation12 + $0xe8] sm:$0xff]  ;;  %v1846_v13 = vld [vmem:[#allocation12 + $0x18] sm:$0xff] }
  0xe7   : > { %v485_v25 = vmul.f32 0.00390625, %v484_v24  ;;  %v1854_v14 = vld [vmem:[#allocation12 + $0x58] sm:$0xff]  ;;  %v1863_v15 = vld [vmem:[#allocation12 + $0xa0] sm:$0xff]  ;;  %v1845_v17 = vld [vmem:[#allocation12 + $0x10] sm:$0xff] }
  0xe8   : > { %v497_v27 = vld.sshfl [vmem:[#allocation1] sm:$0xff pattern:$0x73625140]  ;;  %v498_v28 = vld.sshfl [vmem:[#allocation1 + $0x8] sm:$0xff pattern:$0x73625140] }
  0xe9   : > { %v509_v29 = vsel %vm508_vm10, %v497_v27, 0  ;;  %v511_v30 = vsel %vm508_vm10, %v498_v28, 0  ;;  %v499_v31 = vld.sshfl [vmem:[#allocation1 + $0x10] sm:$0xff pattern:$0x73625140]  ;;  %v489_v32 = vpack.c.bf16 %v485_v25, %v485_v25  ;;  %v1871_v16 = vld [vmem:[#allocation12 + $0xe0] sm:$0xff] }
  0xea   : > { %532 = vmatpush.bf16.msra.mxu0 %v509_v29  ;;  %545 = vmatpush.bf16.msra.mxu1 %v511_v30  ;;  %v513_v33 = vsel %vm508_vm10, %v499_v31, 0  ;;  %v500_v34 = vld.sshfl [vmem:[#allocation1 + $0x18] sm:$0xff pattern:$0x73625140]  ;;  %v1853_v18 = vld [vmem:[#allocation12 + $0x50] sm:$0xff]  ;;  %v1844_v21 = vld [vmem:[#allocation12 + $0x8] sm:$0xff] }
  0xeb   : > { %558 = vmatpush.bf16.msra.mxu2 %v513_v33  ;;  %v515_v35 = vsel %vm508_vm10, %v500_v34, 0  ;;  %630 = vst [vmem:[#allocation1] ss:$4 sm:$0xff] %v487_v26  ;;  %v503_v36 = vld.sshfl [vmem:[#allocation1 + $0x30] sm:$0xff pattern:$0x73625140] }
  0xec   : > { %571 = vmatpush.bf16.msra.mxu3 %v515_v35  ;;  %v521_v37 = vsel %vm508_vm10, %v503_v36, 0  ;;  %v504_v38 = vld.sshfl [vmem:[#allocation1 + $0x38] sm:$0xff pattern:$0x73625140]  ;;  %v1852_v22 = vld [vmem:[#allocation12 + $0x48] sm:$0xff]  ;;  %v1861_v23 = vld [vmem:[#allocation12 + $0x90] sm:$0xff] }
  0xed   : > { %1567 = vmatmul.msk.bf16.vlgmr.msra.gmra.mxu0 %vm426_vm9, %v489_v32  ;;  %1568 = vmatmul.msk.bf16.vlgmr.msra.gmra.mxu1 %vm426_vm9, %v489_v32  ;;  %v523_v40 = vsel %vm508_vm10, %v504_v38, 0  ;;  %v501_v41 = vld.sshfl [vmem:[#allocation1 + $0x20] sm:$0xff pattern:$0x73625140]  ;;  %v1862_v19 = vld [vmem:[#allocation12 + $0x98] sm:$0xff]  ;;  %v1869_v24 = vld [vmem:[#allocation12 + $0xd0] sm:$0xff] }
  0xee   : > { %1569 = vmatmul.msk.bf16.vlgmr.msra.gmra.mxu2 %vm426_vm9, %v489_v32  ;;  %v517_v42 = vsel %vm508_vm10, %v501_v41, 0  ;;  %v502_v43 = vld.sshfl [vmem:[#allocation1 + $0x28] sm:$0xff pattern:$0x73625140]  ;;  %v1870_v20 = vld [vmem:[#allocation12 + $0xd8] sm:$0xff]  ;;  %v1843_v25 = vld [vmem:[#allocation12] sm:$0xff] }
  0xef   : > { %1570 = vmatmul.msk.bf16.vlgmr.msra.gmra.mxu3 %vm426_vm9, %v489_v32  ;;  %610 = vmatpush.bf16.msrb.mxu2 %v521_v37  ;;  %v519_v44 = vsel %vm508_vm10, %v502_v43, 0  ;;  %633 = vst [vmem:[#allocation1 + $0x20] ss:$4 sm:$0xff] %v488_v39  ;;  %v1851_v26 = vld [vmem:[#allocation12 + $0x40] sm:$0xff]  ;;  %v1882_v27 = vld [vmem:[#allocation12 + $0x138] sm:$0xff]  ;;  %v1860_v29 = vld [vmem:[#allocation12 + $0x88] sm:$0xff] }
  0xf0   : > { %623 = vmatpush.bf16.msrb.mxu3 %v523_v40  ;;  %584 = vmatpush.bf16.msrb.mxu0 %v517_v42  ;;  %v1890_v28 = vld [vmem:[#allocation12 + $0x178] sm:$0xff]  ;;  %v1868_v30 = vld [vmem:[#allocation12 + $0xc8] sm:$0xff]  ;;  %v1881_v31 = vld [vmem:[#allocation12 + $0x130] sm:$0xff] }
  0xf1   : > { %597 = vmatpush.bf16.msrb.mxu1 %v519_v44  ;;  %v1859_v33 = vld [vmem:[#allocation12 + $0x80] sm:$0xff]  ;;  %v1898_v37 = vld [vmem:[#allocation12 + $0x1b8] sm:$0xff]  ;;  %v1880_v39 = vld [vmem:[#allocation12 + $0x128] sm:$0xff] }
  0xf2   : > { %v636_v45 = vld.sshfl [vmem:[#allocation1 + $0x10] sm:$0xff pattern:$0x73625140]  ;;  %v637_v46 = vld.sshfl [vmem:[#allocation1 + $0x18] sm:$0xff pattern:$0x73625140] }
  0xf3   : > { %v649_v47 = vsel %vm508_vm10, %v636_v45, 0  ;;  %v651_v48 = vsel %vm508_vm10, %v637_v46, 0  ;;  %v634_v49 = vld.sshfl [vmem:[#allocation1] sm:$0xff pattern:$0x73625140]  ;;  %v1906_v38 = vld [vmem:[#allocation12 + $0x1f8] sm:$0xff] }
  0xf4   : > { %694 = vmatpush.bf16.msra.mxu2 %v649_v47  ;;  %707 = vmatpush.bf16.msra.mxu3 %v651_v48  ;;  %v645_v50 = vsel %vm508_vm10, %v634_v49, 0  ;;  %v635_v51 = vld.sshfl [vmem:[#allocation1 + $0x8] sm:$0xff pattern:$0x73625140]  ;;  %v1867_v34 = vld [vmem:[#allocation12 + $0xc0] sm:$0xff]  ;;  %v1897_v41 = vld [vmem:[#allocation12 + $0x1b0] sm:$0xff] }
  0xf5   : > { %668 = vmatpush.bf16.msra.mxu0 %v645_v50  ;;  %v647_v52 = vsel %vm508_vm10, %v635_v51, 0  ;;  %v1888_v40 = vld [vmem:[#allocation12 + $0x168] sm:$0xff]  ;;  %v1905_v42 = vld [vmem:[#allocation12 + $0x1f0] sm:$0xff]  ;;  %v1879_v43 = vld [vmem:[#allocation12 + $0x120] sm:$0xff] }
  0xf6   : > { %681 = vmatpush.bf16.msra.mxu1 %v647_v52  ;;  %v638_v53 = vld.sshfl [vmem:[#allocation1 + $0x20] sm:$0xff pattern:$0x73625140]  ;;  %v640_v54 = vld.sshfl [vmem:[#allocation1 + $0x30] sm:$0xff pattern:$0x73625140] }
  0xf7   : > { %v641_v55 = vld.sshfl [vmem:[#allocation1 + $0x38] sm:$0xff pattern:$0x73625140]  ;;  %v639_v56 = vld.sshfl [vmem:[#allocation1 + $0x28] sm:$0xff pattern:$0x73625140] }
  0xf8   : > { %v653_v57 = vsel %vm508_vm10, %v638_v53, 0  ;;  %v657_v58 = vsel %vm508_vm10, %v640_v54, 0  ;;  %v659_v59 = vsel %vm508_vm10, %v641_v55, 0  ;;  %v655_v60 = vsel %vm508_vm10, %v639_v56, 0  ;;  %v1887_v44 = vld [vmem:[#allocation12 + $0x160] sm:$0xff]  ;;  %v1896_v48 = vld [vmem:[#allocation12 + $0x1a8] sm:$0xff] }
  0xf9   : > { %v1904_v49 = vld [vmem:[#allocation12 + $0x1e8] sm:$0xff]  ;;  %v1878_v51 = vld [vmem:[#allocation12 + $0x118] sm:$0xff]  ;;  %v1895_v53 = vld [vmem:[#allocation12 + $0x1a0] sm:$0xff] }
  0xfa   : > { %v1886_v52 = vld [vmem:[#allocation12 + $0x158] sm:$0xff]  ;;  %v1903_v54 = vld [vmem:[#allocation12 + $0x1e0] sm:$0xff]  ;;  %v1877_v55 = vld [vmem:[#allocation12 + $0x110] sm:$0xff] }
  0xfb   : > { %v1885_v56 = vld [vmem:[#allocation12 + $0x150] sm:$0xff]  ;;  %v1902_v61 = vld [vmem:[#allocation12 + $0x1d8] sm:$0xff] }
  0xfd   : > { %1571 = vmatmul.msk.bf16.vlgmr.msrb.gmra.mxu0 %vm426_vm9, %v489_v32  ;;  %1572 = vmatmul.msk.bf16.vlgmr.msrb.gmra.mxu1 %vm426_vm9, %v489_v32 }
  0xfe   : > { %1573 = vmatmul.msk.bf16.vlgmr.msrb.gmra.mxu2 %vm426_vm9, %v489_v32  ;;  %720 = vmatpush.bf16.msrb.mxu0 %v653_v57 }
  0xff   : > { %1574 = vmatmul.msk.bf16.vlgmr.msrb.gmra.mxu3 %vm426_vm9, %v489_v32  ;;  %746 = vmatpush.bf16.msrb.mxu2 %v657_v58  ;;  %v1889_v32 = vld [vmem:[#allocation12 + $0x170] sm:$0xff] }
 0x100   : > { %759 = vmatpush.bf16.msrb.mxu3 %v659_v59  ;;  %733 = vmatpush.bf16.msrb.mxu1 %v655_v60  ;;  %v1894_v60 = vld [vmem:[#allocation12 + $0x198] sm:$0xff] }
 0x10d   : > { %1575 = vmatmul.msk.bf16.vlgmr.msra.gmra.mxu0 %vm426_vm9, %v486_v62  ;;  %1576 = vmatmul.msk.bf16.vlgmr.msra.gmra.mxu1 %vm426_vm9, %v486_v62 }
 0x10e   : > { %1577 = vmatmul.msk.bf16.vlgmr.msra.gmra.mxu2 %vm426_vm9, %v486_v62  ;;  %1323 = vmatpush.bf16.msra.mxu0 %v1850_v63  ;;  %v1876_v63 = vld [vmem:[#allocation12 + $0x108] sm:$0xff] }
 0x10f   : > { %1578 = vmatmul.msk.bf16.vlgmr.msra.gmra.mxu3 %vm426_vm9, %v486_v62  ;;  %1336 = vmatpush.bf16.msra.mxu1 %v1858_v0  ;;  %v1884_v0 = vld [vmem:[#allocation12 + $0x148] sm:$0xff] }
 0x110   : > { %1349 = vmatpush.bf16.msra.mxu2 %v1866_v3  ;;  %1362 = vmatpush.bf16.msra.mxu3 %v1874_v4  ;;  %v1875_v3 = vld [vmem:[#allocation12 + $0x100] sm:$0xff] }
 0x111   : > { %v1883_v4 = vld [vmem:[#allocation12 + $0x140] sm:$0xff] }
 0x112   : > { %1324 = vmatpush.bf16.msra.mxu0 %v1849_v1  ;;  %v1893_v1 = vld [vmem:[#allocation12 + $0x190] sm:$0xff] }
 0x113   : > { %1337 = vmatpush.bf16.msra.mxu1 %v1857_v2  ;;  %v1901_v2 = vld [vmem:[#allocation12 + $0x1d0] sm:$0xff] }
 0x114   : > { %1350 = vmatpush.bf16.msra.mxu2 %v1865_v7  ;;  %1363 = vmatpush.bf16.msra.mxu3 %v1873_v8  ;;  %v1892_v8 = vld [vmem:[#allocation12 + $0x188] sm:$0xff] }
 0x116   : > { %1325 = vmatpush.bf16.msra.mxu0 %v1848_v5 }
 0x117   : > { %1338 = vmatpush.bf16.msra.mxu1 %v1856_v6 }
 0x118   : > { %1351 = vmatpush.bf16.msra.mxu2 %v1864_v11  ;;  %1364 = vmatpush.bf16.msra.mxu3 %v1872_v12  ;;  %v2521_v11 = vld [vmem:[#allocation10] sm:$0xff]  ;;  %v1891_v12 = vld [vmem:[#allocation12 + $0x180] sm:$0xff] }
 0x11a   : > { %1326 = vmatpush.bf16.msra.mxu0 %v1847_v9  ;;  %v1900_v9 = vld [vmem:[#allocation12 + $0x1c8] sm:$0xff] }
 0x11b   : > { %1339 = vmatpush.bf16.msra.mxu1 %v1855_v10 }
 0x11c   : > { %1352 = vmatpush.bf16.msra.mxu2 %v1863_v15  ;;  %1365 = vmatpush.bf16.msra.mxu3 %v1871_v16  ;;  %v767_v15 = vperm.slane %v2521_v11, 0 }
 0x11d   : > { %1579 = vmatmul.msk.bf16.vlgmr.msrb.gmra.mxu0 %vm426_vm9, %v486_v62  ;;  %1580 = vmatmul.msk.bf16.vlgmr.msrb.gmra.mxu1 %vm426_vm9, %v486_v62 }
 0x11e   : > { %1581 = vmatmul.msk.bf16.vlgmr.msrb.gmra.mxu2 %vm426_vm9, %v486_v62  ;;  %1327 = vmatpush.bf16.msra.mxu0 %v1846_v13  ;;  %v1899_v13 = vld [vmem:[#allocation12 + $0x1c0] sm:$0xff] }
 0x11f   : > { %1582 = vmatmul.msk.bf16.vlgmr.msrb.gmra.mxu3 %vm426_vm9, %v486_v62  ;;  %1340 = vmatpush.bf16.msra.mxu1 %v1854_v14 }
 0x120   : > { %1353 = vmatpush.bf16.msra.mxu2 %v1862_v19  ;;  %1366 = vmatpush.bf16.msra.mxu3 %v1870_v20 }
 0x122   : > { %1328 = vmatpush.bf16.msra.mxu0 %v1845_v17 }
 0x123   : > { %1341 = vmatpush.bf16.msra.mxu1 %v1853_v18  ;;  %v768_v18 = vperm.slane %v2521_v11, 1 }
 0x124   : > { %1354 = vmatpush.bf16.msra.mxu2 %v1861_v23  ;;  %1367 = vmatpush.bf16.msra.mxu3 %v1869_v24 }
 0x126   : > { %1329 = vmatpush.bf16.msra.mxu0 %v1844_v21 }
 0x127   : > { %1342 = vmatpush.bf16.msra.mxu1 %v1852_v22 }
 0x128   : > { %1355 = vmatpush.bf16.msra.mxu2 %v1860_v29  ;;  %1368 = vmatpush.bf16.msra.mxu3 %v1868_v30  ;;  %v770_v29 = vperm.slane %v2521_v11, 3 }
 0x12a   : > { %1330 = vmatpush.bf16.msra.mxu0 %v1843_v25 }
 0x12b   : > { %1343 = vmatpush.bf16.msra.mxu1 %v1851_v26  ;;  %v769_v26 = vperm.slane %v2521_v11, 2 }
 0x12c   : > { %1356 = vmatpush.bf16.msra.mxu2 %v1859_v33  ;;  %1369 = vmatpush.bf16.msra.mxu3 %v1867_v34 }
 0x12e   : > { %1375 = vmatpush.bf16.msrb.mxu0 %v1882_v27 }
 0x12f   : > { %1388 = vmatpush.bf16.msrb.mxu1 %v1890_v28 }
 0x130   : > { %1401 = vmatpush.bf16.msrb.mxu2 %v1898_v37  ;;  %1414 = vmatpush.bf16.msrb.mxu3 %v1906_v38 }
 0x132   : > { %1376 = vmatpush.bf16.msrb.mxu0 %v1881_v31 }
 0x133   : > { %1389 = vmatpush.bf16.msrb.mxu1 %v1889_v32 }
 0x134   : > { %1402 = vmatpush.bf16.msrb.mxu2 %v1897_v41  ;;  %1415 = vmatpush.bf16.msrb.mxu3 %v1905_v42 }
 0x136   : > { %1377 = vmatpush.bf16.msrb.mxu0 %v1880_v39 }
 0x137   : > { %1390 = vmatpush.bf16.msrb.mxu1 %v1888_v40 }
 0x138   : > { %1403 = vmatpush.bf16.msrb.mxu2 %v1896_v48  ;;  %1416 = vmatpush.bf16.msrb.mxu3 %v1904_v49 }
 0x13a   : > { %1378 = vmatpush.bf16.msrb.mxu0 %v1879_v43  ;;  %v771_v43 = vperm.slane %v2521_v11, 4 }
 0x13b   : > { %1391 = vmatpush.bf16.msrb.mxu1 %v1887_v44 }
 0x13c   : > { %1404 = vmatpush.bf16.msrb.mxu2 %v1895_v53  ;;  %1417 = vmatpush.bf16.msrb.mxu3 %v1903_v54  ;;  %v773_v54 = vperm.slane %v2521_v11, 6 }
 0x13e   : > { %1379 = vmatpush.bf16.msrb.mxu0 %v1878_v51 }
 0x13f   : > { %1392 = vmatpush.bf16.msrb.mxu1 %v1886_v52 }
 0x140   : > { %1405 = vmatpush.bf16.msrb.mxu2 %v1894_v60  ;;  %1418 = vmatpush.bf16.msrb.mxu3 %v1902_v61 }
 0x142   : > { %1380 = vmatpush.bf16.msrb.mxu0 %v1877_v55 }
 0x143   : > { %1393 = vmatpush.bf16.msrb.mxu1 %v1885_v56 }
 0x144   : > { %1406 = vmatpush.bf16.msrb.mxu2 %v1893_v1  ;;  %1419 = vmatpush.bf16.msrb.mxu3 %v1901_v2 }
 0x146   : > { %1381 = vmatpush.bf16.msrb.mxu0 %v1876_v63 }
 0x147   : > { %1394 = vmatpush.bf16.msrb.mxu1 %v1884_v0 }
 0x148   : > { %1407 = vmatpush.bf16.msrb.mxu2 %v1892_v8  ;;  %1420 = vmatpush.bf16.msrb.mxu3 %v1900_v9 }
 0x14a   : > { %1382 = vmatpush.bf16.msrb.mxu0 %v1875_v3 }
 0x14b   : > { %1395 = vmatpush.bf16.msrb.mxu1 %v1883_v4 }
 0x14c   : > { %1408 = vmatpush.bf16.msrb.mxu2 %v1891_v12  ;;  %1421 = vmatpush.bf16.msrb.mxu3 %v1899_v13 }
 0x16a   : > { %v2505_v35 = vpop.f32.mrf.mxu0  ;;  %v2507_v36 = vpop.f32.mrf.mxu1 }
 0x171   : > { %v2509_v45 = vpop.f32.mrf.mxu2 }
 0x172   : > { %v2511_v46 = vpop.f32.mrf.mxu3  ;;  %v536_v47 = vpop.f32.mrf.mxu0 }
 0x173   : > { %v549_v50 = vpop.f32.mrf.mxu1 }
 0x179   : > { %v562_v57 = vpop.f32.mrf.mxu2 }
 0x17a   : > { %v575_v58 = vpop.f32.mrf.mxu3  ;;  %v2513_v59 = vpop.f32.mrf.mxu0  ;;  %v774_v57 = vperm.slane %v2521_v11, 7 }
 0x17b   : > { %v2515_v62 = vpop.f32.mrf.mxu1 }
 0x181   : > { %v2517_v5 = vpop.f32.mrf.mxu2 }
 0x182   : > { %v2519_v6 = vpop.f32.mrf.mxu3  ;;  %v588_v7 = vpop.f32.mrf.mxu0 }
 0x183   : > { %v601_v10 = vpop.f32.mrf.mxu1 }
 0x189   : > { %v614_v14 = vpop.f32.mrf.mxu2 }
 0x18a   : > { %v627_v16 = vpop.f32.mrf.mxu3  ;;  %v670_v17 = vpop.f32.mrf.mxu0 }
 0x18b   : > { %v671_v19 = vadd.f32 %v670_v17, %v2505_v35  ;;  %v683_v20 = vpop.f32.mrf.mxu1 }
 0x18c   : > { %v684_v21 = vadd.f32 %v683_v20, %v2507_v36 }
 0x18d   : > { %v783_v22 = vadd.f32 %v767_v15, %v671_v19 }
 0x18e   : > { %v784_v23 = vadd.f32 %v768_v18, %v684_v21 }
 0x18f   : > { %v791_v24 = vmax.f32 %v783_v22, 0.0 }
 0x190   : > { %v792_v25 = vmax.f32 %v784_v23, 0.0 }
 0x191   : > { %v799_v27 = vpack.c.bf16 %v791_v24, %v791_v24  ;;  %v696_v28 = vpop.f32.mrf.mxu2 }
 0x192   : > { %v800_v30 = vpack.c.bf16 %v792_v25, %v792_v25  ;;  %v697_v31 = vadd.f32 %v696_v28, %v2509_v45  ;;  %v709_v32 = vpop.f32.mrf.mxu3  ;;  %v672_v33 = vpop.f32.mrf.mxu0  ;;  %v772_v45 = vperm.slane %v2521_v11, 5 }
 0x193   : > { %v710_v34 = vadd.f32 %v709_v32, %v2511_v46  ;;  %v685_v35 = vpop.f32.mrf.mxu1  ;;  %1331 = vmatmul.bf16.vlgmr.msra.gmra.mxu0 %v799_v27 }
 0x194   : > { %v785_v36 = vadd.f32 %v769_v26, %v697_v31  ;;  %1344 = vmatmul.bf16.vlgmr.msra.gmra.mxu1 %v800_v30 }
 0x195   : > { %v786_v37 = vadd.f32 %v770_v29, %v710_v34 }
 0x196   : > { %v793_v38 = vmax.f32 %v785_v36, 0.0 }
 0x197   : > { %v794_v39 = vmax.f32 %v786_v37, 0.0 }
 0x198   : > { %v801_v40 = vpack.c.bf16 %v793_v38, %v793_v38 }
 0x199   : > { %v802_v41 = vpack.c.bf16 %v794_v39, %v794_v39  ;;  %v698_v42 = vpop.f32.mrf.mxu2 }
 0x19a   : > { %v711_v44 = vpop.f32.mrf.mxu3  ;;  %1357 = vmatmul.bf16.vlgmr.msra.gmra.mxu2 %v801_v40  ;;  %v722_v47 = vpop.f32.mrf.mxu0 }
 0x19b   : > { %1370 = vmatmul.bf16.vlgmr.msra.gmra.mxu3 %v802_v41  ;;  %v723_v46 = vadd.f32 %v722_v47, %v2513_v59  ;;  %v735_v48 = vpop.f32.mrf.mxu1 }
 0x19c   : > { %v736_v49 = vadd.f32 %v735_v48, %v2515_v62 }
 0x19d   : > { %v787_v50 = vadd.f32 %v771_v43, %v723_v46 }
 0x19e   : > { %v788_v51 = vadd.f32 %v772_v45, %v736_v49 }
 0x19f   : > { %v795_v52 = vmax.f32 %v787_v50, 0.0 }
 0x1a0   : > { %v796_v53 = vmax.f32 %v788_v51, 0.0 }
 0x1a1   : > { %v803_v55 = vpack.c.bf16 %v795_v52, %v795_v52  ;;  %v748_v56 = vpop.f32.mrf.mxu2 }
 0x1a2   : > { %v804_v58 = vpack.c.bf16 %v796_v53, %v796_v53  ;;  %v749_v60 = vadd.f32 %v748_v56, %v2517_v5  ;;  %v761_v61 = vpop.f32.mrf.mxu3  ;;  %v724_v63 = vpop.f32.mrf.mxu0  ;;  %v2016_v5 = vld [vmem:[%s2570_s5] ss:$0 sm:$0xff] }
 0x1a3   : > { %v762_v59 = vadd.f32 %v761_v61, %v2519_v6  ;;  %1383 = vmatmul.bf16.vlgmr.msrb.gmra.mxu0 %v803_v55  ;;  %v737_v0 = vpop.f32.mrf.mxu1 }
 0x1a4   : > { %v789_v62 = vadd.f32 %v773_v54, %v749_v60  ;;  %1396 = vmatmul.bf16.vlgmr.msrb.gmra.mxu1 %v804_v58 }
 0x1a5   : > { %v790_v1 = vadd.f32 %v774_v57, %v762_v59 }
 0x1a6   : > { %v797_v2 = vmax.f32 %v789_v62, 0.0 }
 0x1a7   : > { %v798_v3 = vmax.f32 %v790_v1, 0.0 }
 0x1a8   : > { %v805_v4 = vpack.c.bf16 %v797_v2, %v797_v2 }
 0x1a9   : > { %v806_v7 = vpack.c.bf16 %v798_v3, %v798_v3  ;;  %v750_v8 = vpop.f32.mrf.mxu2 }
 0x1aa   : > { %v763_v9 = vpop.f32.mrf.mxu3  ;;  %1409 = vmatmul.bf16.vlgmr.msrb.gmra.mxu2 %v805_v4 }
 0x1ab   : > { %1422 = vmatmul.bf16.vlgmr.msrb.gmra.mxu3 %v806_v7 }
 0x210   : > { %v1332_v10 = vpop.f32.mrf.mxu0 }
 0x211   : > { %v1345_v11 = vpop.f32.mrf.mxu1  ;;  %v1333_v13 = vadd.f32 %v2016_v5, %v1332_v10 }
 0x213   : > { %v1346_v15 = vadd.f32 %v1345_v11, %v1333_v13 }
 0x218   : > { %v1334_v6 = vpop.f32.mrf.mxu0 }
 0x219   : > { %v1347_v12 = vpop.f32.mrf.mxu1 }
 0x21d   : > { %v1358_v14 = vpop.f32.mrf.mxu2 }
 0x21e   : > { %v1371_v16 = vpop.f32.mrf.mxu3  ;;  %v1359_v17 = vadd.f32 %v1358_v14, %v1346_v15 }
 0x220   : > { %v1384_v18 = vpop.f32.mrf.mxu0  ;;  %v1372_v20 = vadd.f32 %v1371_v16, %v1359_v17 }
 0x221   : > { %v1397_v19 = vpop.f32.mrf.mxu1 }
 0x222   : > { %v1385_v23 = vadd.f32 %v1384_v18, %v1372_v20 }
 0x224   : > { %v1398_v26 = vadd.f32 %v1397_v19, %v1385_v23 }
 0x225   : > { %v1360_v21 = vpop.f32.mrf.mxu2 }
 0x226   : > { %v1373_v22 = vpop.f32.mrf.mxu3 }
 0x228   : > { %v1386_v24 = vpop.f32.mrf.mxu0 }
 0x229   : > { %v1399_v25 = vpop.f32.mrf.mxu1 }
 0x22d   : > { %v1410_v27 = vpop.f32.mrf.mxu2 }
 0x22e   : > { %v1411_v28 = vadd.f32 %v1410_v27, %v1398_v26  ;;  %v1423_v29 = vpop.f32.mrf.mxu3 }
 0x230   : > { %v1424_v30 = vadd.f32 %v1423_v29, %v1411_v28 }
 0x232   : > { %1427 = vmax.xlane.f32.xlu0 %v1424_v30 }
 0x235   : > { %v1412_v31 = vpop.f32.mrf.mxu2 }
 0x236   : > { %v1425_v32 = vpop.f32.mrf.mxu3 }
 0x2a5   : > { %v1428_v33 = vpop.xlane.xlu0 %1427 }
 0x2a6   : > { %v1429_v34 = vsub.f32 %v1424_v30, %v1428_v33 }
 0x2a8   : > { %v1430_v35 = vmul.f32 1.442695, %v1429_v34 }
 0x2aa   : > { %2017 = vpow2.f32 %v1430_v35 }
 0x2b0   : > { %v2018_v36 = vpop.eup %2017 }
 0x2b1   : > { %1432 = vadd.xlane.f32.xlu0 %v2018_v36 }
 0x324   : > { %v1433_v37 = vpop.xlane.xlu0 %1432 }
 0x325   : > { %2019 = vlog2.f32 %v1433_v37 }
 0x32b   : > { %v2020_v38 = vpop.eup %2019 }
 0x32c   : > { %v1435_v39 = vmul.f32 0.6931472, %v2020_v38 }
 0x32e   : > { %v1436_v40 = vsub.f32 %v1429_v34, %v1435_v39 }
 0x330   : > { %1437 = vst [vmem:[#allocation13] sm:$0xff] %v1436_v40 }
 0x331 PF: > { %s2582_s27 = sadd.s32 4294967295, %s2261_s26   ;;  %s1448_s9 = sshll.u32 %s2571_s6, 4  ;;  %s1449_s9 = int_to_ptr.hbm [resolvable:$true] %s1448_s9 }
 0x332   : > { %p1955_p3 = scmp.eq.s32.totalorder %s2582_s27, 1  ;;  %s2273_s13 = smov [#allocation13]  }
 0x333   : > { %s1446_s18 = sshll.u32 %s2273_s13, 4  ;;  %s1447_s18 = int_to_ptr.vmem [resolvable:$true] %s1446_s18 }
 0x334   : > { %1926 = dma.vmem_to_hbm [thread:$0]  (%p1955_p3), %s1447_s18, 128, %s1449_s9, [#allocation6]  }
 0x335   : > { %2236 = dma.done.wait (%p1955_p3), [#allocation6], 128  }
 0x336   : > { %2238 = vsyncadd (%p1955_p3), [#allocation6], 4294967168 }
 0x337 PF: > { %s22_s26 = sadd.s32 1, %s2261_s26   ;;  %s2583_s21 = smov %s2245_s22 }
 0x338   : > { %p19_p4 = scmp.ge.s32.totalorder %s22_s26, 4   ;;  %s2584_s22 = smov %s2249_s23 }
 0x339   : > { %s2585_s23 = smov %s2404_s30  ;;  %s2586_s24 = smov %s2257_s25 }
 0x33a   : > { %s2587_s25 = smov %s2589_s16  ;;  %21 = sbr.rel (!%p19_p4) target bundleno = 9 (0x9), region = 108 }
 0x33f   :  { %1462 = vsyncpa [#allocation5], 1 }
 0x340   :  { %1464 = vsyncpa [#allocation5 + $0x1], 1 }
 0x341   :  { %1465 = vsyncpa [#allocation8], 1 }
 0x342   :  { %1466 = vsyncpa [#allocation11], 1 }
 0x343   :  { %1467 = vsyncpa [#allocation6], 1 }
 0x344   :  { %1469 = vsyncpa [#allocation6 + $0x1], 1 }

</bundles_post_ra>
